<compile_context>
chip_gen: v7x
topology: tpu7x:2x2x1
jax: 0.10.0
libtpu: 0.0.40
codegen_flags: <defaults>
</compile_context>

<pallas_src>
from functools import partial

import jax
import jax.numpy as jnp
from jax import lax
from jax.experimental import pallas as pl
from jax.experimental.pallas import tpu as pltpu

NEG_INF = -1e30
LANE = 128        # lane width of the hidden dataflow / output slab
F_PAD = 16        # node features padded 15 -> 16 (true lane width of x)
HIDDEN = 32       # GATConv hidden size

# Row offsets inside the packed weight slab (all multiples of 8 sublanes).
R_W1 = 0          # rows [0, 16):   GATConv-1 weight  (15,32)  zero-padded
R_W2 = 16         # rows [16, 48):  GATConv-2 weight  (32,32)  zero-padded
R_WL = 48         # rows [48, 80):  final Linear      (32,20)  zero-padded
R_VEC = 80        # rows [80, 88):  packed (1,128) vectors
#   +0 att_src1, +1 att_dst1, +2 att_src2, +3 att_dst2,
#   +4 b1, +5 b2, +6 bl, +7 [c1, c2, 0, ...]
SLAB_ROWS = 88


# ------------------------------- kernel ---------------------------------

def _mxdot(a, b):
    """MXU matmul with bf16 operands and f32 accumulation."""
    return jnp.dot(a.astype(jnp.bfloat16), b.astype(jnp.bfloat16),
                   preferred_element_type=jnp.float32)


def grid_model_kernel(g_ref, x_ref, slab_ref, out_ref):
    # Per-graph tensors (batch dim squeezed by the BlockSpec).
    maskb = g_ref[0].astype(jnp.float32)          # (N, N) 0 / -1e30
    eattr = g_ref[1].astype(jnp.float32)          # (N, N) dense edge_attr (+ self loops)
    x = x_ref[...]                                # (N, 16) f32 node features

    # Weights (resident slab).
    w1 = slab_ref[pl.ds(R_W1, F_PAD), :]          # (16, 128)
    w2 = slab_ref[pl.ds(R_W2, HIDDEN), :]         # (32, 128)
    wl = slab_ref[pl.ds(R_WL, HIDDEN), :]         # (32, 128)
    vecs = slab_ref[pl.ds(R_VEC, 8), :]           # (8, 128) packed vectors
    c1 = vecs[7:8, 0:1]                           # (1, 1) edge coefficient, layer 1
    c2 = vecs[7:8, 1:2]                           # (1, 1) edge coefficient, layer 2

    def gat_layer(xin, e_scaled, w, att_s, att_d, bias):
        """Dense GATConv (heads=1, concat=True, negative_slope=0.2)."""
        h = _mxdot(xin, w)                                               # (N, 128)
        # alpha_src[j] as a row, alpha_dst[i] as a column (padded lanes of the
        # attention vectors are zero, so the 128-lane contraction is exact).
        s = lax.dot_general(att_s, h, (((1,), (1,)), ((), ())),
                            preferred_element_type=jnp.float32)          # (1, N)
        d = lax.dot_general(h, att_d, (((1,), (1,)), ((), ())),
                            preferred_element_type=jnp.float32)          # (N, 1)
        logits = d + s + e_scaled                                        # (N, N)
        logits = jnp.where(logits >= 0.0, logits, 0.2 * logits)          # leaky_relu
        logits = logits + maskb                                          # mask non-edges
        m = jnp.max(logits, axis=-1, keepdims=True)
        p = jnp.exp(logits - m)
        attn = p * pl.reciprocal(jnp.sum(p, axis=-1, keepdims=True), approx=True)
        return _mxdot(attn, h) + bias                                    # (N, 128)

    # ---- GATConv 1 + ReLU (F.dropout in eval mode == identity) ----
    # TODO(synk): training-mode dropout randomness is not implemented (inference only).
    h1 = gat_layer(x, c1 * eattr, w1, vecs[0:1, :], vecs[1:2, :], vecs[4:5, :])
    h1 = jnp.maximum(h1, 0.0)

    # ---- GATConv 2 (only the first HIDDEN lanes of h1 are real) ----
    h2 = gat_layer(h1[:, :HIDDEN], c2 * eattr, w2,
                   vecs[2:3, :], vecs[3:4, :], vecs[5:6, :])

    # ---- final Linear (lane-dense 128-wide output; wrapper slices to 20) ----
    out_ref[...] = _mxdot(h2[:, :HIDDEN], wl) + vecs[6:7, :]


# ------------------------------- wrapper --------------------------------

def extended_electrical_grid_forward(x, graph, slab, target_size=20):
    """x: (B, N, 15) f32, graph: (B, 2, N, N) bf16, slab: (88, 128) f32."""
    B, N, F = x.shape
    # Pad node features to a 16-lane width (zeros hit zero weight rows).
    x_pad = jnp.zeros((B, N, F_PAD), jnp.float32).at[:, :, :F].set(x)

    out = pl.pallas_call(
        grid_model_kernel,
        out_shape=jax.ShapeDtypeStruct((B, N, LANE), jnp.float32),
        grid=(B,),
        in_specs=[
            pl.BlockSpec((None, 2, N, N), lambda b: (b, 0, 0, 0)),   # graph planes
            pl.BlockSpec((None, N, F_PAD), lambda b: (b, 0, 0)),     # node features
            pl.BlockSpec((SLAB_ROWS, LANE), lambda b: (0, 0)),       # resident slab
        ],
        out_specs=pl.BlockSpec((None, N, LANE), lambda b: (b, 0, 0)),
        compiler_params=pltpu.CompilerParams(
            dimension_semantics=("parallel",)),
    )(graph, x_pad, slab)
    return out[:, :, :target_size]


# --------------------------- host-side packing ---------------------------

def build_graph_tensor(src, dst, edge_attr, num_nodes):
    """Dense [mask bias, edge_attr] planes for one graph, in bf16.

    Mirrors PyG GATConv preprocessing: self-loops added with
    fill_value='mean' (per-destination mean of incoming edge_attr).
    """
    ea = edge_attr[:, 0]
    mask = jnp.zeros((num_nodes, num_nodes), jnp.float32).at[dst, src].set(1.0)
    e = jnp.zeros((num_nodes, num_nodes), jnp.float32).at[dst, src].set(ea)
    s_sum = jnp.zeros((num_nodes,), jnp.float32).at[dst].add(ea)
    s_cnt = jnp.zeros((num_nodes,), jnp.float32).at[dst].add(1.0)
    loop_attr = jnp.where(s_cnt > 0, s_sum / jnp.maximum(s_cnt, 1.0), 0.0)
    diag = jnp.arange(num_nodes)
    mask = mask.at[diag, diag].set(1.0)
    e = e.at[diag, diag].set(loop_attr)
    maskb = jnp.where(mask > 0.0, 0.0, NEG_INF)
    return jnp.stack([maskb, e], axis=0).astype(jnp.bfloat16)


def pack_params(params):
    """Pack all weights into one zero-padded (88, 128) f32 slab."""
    slab = jnp.zeros((SLAB_ROWS, LANE), jnp.float32)

    def put(s, r, arr):
        return s.at[r:r + arr.shape[0], :arr.shape[1]].set(arr)

    slab = put(slab, R_W1, params["w1"])                 # (15, 32)
    slab = put(slab, R_W2, params["w2"])                 # (32, 32)
    slab = put(slab, R_WL, params["wl"])                 # (32, 20)
    slab = put(slab, R_VEC + 0, params["att_src1"])      # (1, 32)
    slab = put(slab, R_VEC + 1, params["att_dst1"])      # (1, 32)
    slab = put(slab, R_VEC + 2, params["att_src2"])      # (1, 32)
    slab = put(slab, R_VEC + 3, params["att_dst2"])      # (1, 32)
    slab = put(slab, R_VEC + 4, params["b1"])            # (1, 32)
    slab = put(slab, R_VEC + 5, params["b2"])            # (1, 32)
    slab = put(slab, R_VEC + 6, params["bl"])            # (1, 20)
    slab = slab.at[R_VEC + 7, 0].set(params["c1"])       # edge coeff layer 1
    slab = slab.at[R_VEC + 7, 1].set(params["c2"])       # edge coeff layer 2
    return slab


def init_params(key, num_features=15, hidden_size=32, target_size=20,
                num_edge_features=1):
    keys = jax.random.split(key, 12)

    def glorot(k, shape):
        fan_in, fan_out = shape[0], shape[-1]
        scale = jnp.sqrt(6.0 / (fan_in + fan_out))
        return jax.random.uniform(k, shape, jnp.float32, -scale, scale)

    # GATConv 1
    w1 = glorot(keys[0], (num_features, hidden_size))
    att_src1 = glorot(keys[1], (1, hidden_size))
    att_dst1 = glorot(keys[2], (1, hidden_size))
    att_edge1 = glorot(keys[3], (1, hidden_size))
    w_edge1 = glorot(keys[4], (num_edge_features, hidden_size))
    b1 = jnp.zeros((1, hidden_size), jnp.float32)
    c1 = jnp.sum(att_edge1 * w_edge1)   # edge_dim==1 => alpha_edge = c * edge_attr

    # GATConv 2
    w2 = glorot(keys[5], (hidden_size, hidden_size))
    att_src2 = glorot(keys[6], (1, hidden_size))
    att_dst2 = glorot(keys[7], (1, hidden_size))
    att_edge2 = glorot(keys[8], (1, hidden_size))
    w_edge2 = glorot(keys[9], (num_edge_features, hidden_size))
    b2 = jnp.zeros((1, hidden_size), jnp.float32)
    c2 = jnp.sum(att_edge2 * w_edge2)

    # final Linear
    wl = glorot(keys[10], (hidden_size, target_size))
    bl = glorot(keys[11], (1, target_size))

    return dict(w1=w1, att_src1=att_src1, att_dst1=att_dst1, b1=b1, c1=c1,
                w2=w2, att_src2=att_src2, att_dst2=att_dst2, b2=b2, c2=c2,
                wl=wl, bl=bl)


if __name__ == "__main__":
    BATCH = 4
    NUM_NODES = 16
    NUM_FEATURES = 15
    HIDDEN_SIZE = 32
    TARGET = 20

    key = jax.random.PRNGKey(0)
    kx, ke, kp = jax.random.split(key, 3)

    # node features for a batch of graphs: (B, N, 15)
    x = jax.random.normal(kx, (BATCH, NUM_NODES, NUM_FEATURES), jnp.float32)

    # bidirectional ring graph topology (shared), per-graph edge attributes
    idx = jnp.arange(NUM_NODES)
    src = jnp.concatenate([idx, (idx + 1) % NUM_NODES])
    dst = jnp.concatenate([(idx + 1) % NUM_NODES, idx])
    edge_attr = jax.random.uniform(ke, (BATCH, src.shape[0], 1), jnp.float32)

    params = init_params(kp, NUM_FEATURES, HIDDEN_SIZE, TARGET, num_edge_features=1)
    graphs = jnp.stack([build_graph_tensor(src, dst, edge_attr[b], NUM_NODES)
                        for b in range(BATCH)], axis=0)       # (B, 2, N, N) bf16
    slab = pack_params(params)                                # (88, 128) f32

    fwd = jax.jit(partial(extended_electrical_grid_forward, target_size=TARGET))
    out = fwd(x, graphs, slab)
    out = jax.block_until_ready(out)
    assert out.shape == (BATCH, NUM_NODES, TARGET)
    assert bool(jnp.all(jnp.isfinite(out)))
    print("KERNEL_OK")
</pallas_src>

<mosaic_0001>
module attributes {stable_mosaic.version = 11 : i64} {
  func.func @grid_model_kernel(%arg0: i32, %arg1: memref<1x2x16x16xbf16, #tpu.memory_space<vmem>>, %arg2: memref<1x16x16xf32, #tpu.memory_space<vmem>>, %arg3: memref<88x128xf32, #tpu.memory_space<vmem>>, %arg4: memref<1x16x128xf32, #tpu.memory_space<vmem>>) attributes {dimension_semantics = [#tpu.dimension_semantics<parallel>], iteration_bounds = array<i64: 4>, scalar_prefetch = 0 : i64, scratch_operands = 0 : i64, tpu.core_type = #tpu.core_type<tc>, window_params = [{transform_indices = @transform_0, window_bounds = array<i64: 1, 2, 16, 16>}, {transform_indices = @transform_1, window_bounds = array<i64: 1, 16, 16>}, {pipeline_mode = #tpu.pipeline_mode<synchronous>, transform_indices = @transform_2, window_bounds = array<i64: 88, 128>}, {transform_indices = @transform_3, window_bounds = array<i64: 1, 16, 128>}]} {
    %c0 = arith.constant 0 : index
    %c0_0 = arith.constant 0 : index
    %c0_1 = arith.constant 0 : index
    %c0_2 = arith.constant 0 : index
    %0 = vector.load %arg1[%c0, %c0_0, %c0_1, %c0_2] : memref<1x2x16x16xbf16, #tpu.memory_space<vmem>>, vector<1x1x16x16xbf16>
    %1 = vector.shape_cast %0 : vector<1x1x16x16xbf16> to vector<16x16xbf16>
    %2 = arith.extf %1 : vector<16x16xbf16> to vector<16x16xf32>
    %c0_3 = arith.constant 0 : index
    %c1 = arith.constant 1 : index
    %c0_4 = arith.constant 0 : index
    %c0_5 = arith.constant 0 : index
    %3 = vector.load %arg1[%c0_3, %c1, %c0_4, %c0_5] : memref<1x2x16x16xbf16, #tpu.memory_space<vmem>>, vector<1x1x16x16xbf16>
    %4 = vector.shape_cast %3 : vector<1x1x16x16xbf16> to vector<16x16xbf16>
    %5 = arith.extf %4 : vector<16x16xbf16> to vector<16x16xf32>
    %c0_6 = arith.constant 0 : index
    %c0_7 = arith.constant 0 : index
    %c0_8 = arith.constant 0 : index
    %6 = vector.load %arg2[%c0_6, %c0_7, %c0_8] : memref<1x16x16xf32, #tpu.memory_space<vmem>>, vector<1x16x16xf32>
    %7 = vector.shape_cast %6 : vector<1x16x16xf32> to vector<16x16xf32>
    %c0_9 = arith.constant 0 : index
    %c0_10 = arith.constant 0 : index
    %8 = vector.load %arg3[%c0_9, %c0_10] : memref<88x128xf32, #tpu.memory_space<vmem>>, vector<16x128xf32>
    %c16 = arith.constant 16 : index
    %c0_11 = arith.constant 0 : index
    %9 = vector.load %arg3[%c16, %c0_11] : memref<88x128xf32, #tpu.memory_space<vmem>>, vector<32x128xf32>
    %c48 = arith.constant 48 : index
    %c0_12 = arith.constant 0 : index
    %10 = vector.load %arg3[%c48, %c0_12] : memref<88x128xf32, #tpu.memory_space<vmem>>, vector<32x128xf32>
    %c80 = arith.constant 80 : index
    %c0_13 = arith.constant 0 : index
    %11 = vector.load %arg3[%c80, %c0_13] : memref<88x128xf32, #tpu.memory_space<vmem>>, vector<8x128xf32>
    %12 = vector.extract_strided_slice %11 {offsets = [7, 0], sizes = [1, 1], strides = [1, 1]} : vector<8x128xf32> to vector<1x1xf32>
    %13 = vector.extract_strided_slice %11 {offsets = [7, 1], sizes = [1, 1], strides = [1, 1]} : vector<8x128xf32> to vector<1x1xf32>
    %14 = vector.broadcast %12 : vector<1x1xf32> to vector<16x16xf32>
    %15 = arith.mulf %14, %5 : vector<16x16xf32>
    %16 = vector.extract_strided_slice %11 {offsets = [0, 0], sizes = [1, 128], strides = [1, 1]} : vector<8x128xf32> to vector<1x128xf32>
    %17 = vector.extract_strided_slice %11 {offsets = [1, 0], sizes = [1, 128], strides = [1, 1]} : vector<8x128xf32> to vector<1x128xf32>
    %18 = vector.extract_strided_slice %11 {offsets = [4, 0], sizes = [1, 128], strides = [1, 1]} : vector<8x128xf32> to vector<1x128xf32>
    %19 = arith.truncf %7 : vector<16x16xf32> to vector<16x16xbf16>
    %20 = arith.truncf %8 : vector<16x128xf32> to vector<16x128xbf16>
    %cst = arith.constant dense<0.000000e+00> : vector<16x128xf32>
    %21 = tpu.matmul %19, %20, %cst {dimension_numbers = #tpu.dot_dimension_numbers<[1], [0], [0], [1], [0, 0, 1, 1], [], []>} : vector<16x16xbf16>, vector<16x128xbf16>, vector<16x128xf32> -> vector<16x128xf32>
    %cst_14 = arith.constant dense<0.000000e+00> : vector<1x16xf32>
    %22 = tpu.matmul %16, %21, %cst_14 {dimension_numbers = #tpu.dot_dimension_numbers<[1], [1], [0], [0], [0, 0, 1, 0], [], []>} : vector<1x128xf32>, vector<16x128xf32>, vector<1x16xf32> -> vector<1x16xf32>
    %cst_15 = arith.constant dense<0.000000e+00> : vector<16x1xf32>
    %23 = tpu.matmul %21, %17, %cst_15 {dimension_numbers = #tpu.dot_dimension_numbers<[1], [1], [0], [0], [0, 0, 1, 0], [], []>} : vector<16x128xf32>, vector<1x128xf32>, vector<16x1xf32> -> vector<16x1xf32>
    %24 = vector.broadcast %23 : vector<16x1xf32> to vector<16x16xf32>
    %25 = vector.broadcast %22 : vector<1x16xf32> to vector<16x16xf32>
    %26 = arith.addf %24, %25 : vector<16x16xf32>
    %27 = arith.addf %26, %15 : vector<16x16xf32>
    %cst_16 = arith.constant 0.000000e+00 : f32
    %28 = vector.broadcast %cst_16 : f32 to vector<16x16xf32>
    %29 = arith.cmpf oge, %27, %28 : vector<16x16xf32>
    %cst_17 = arith.constant 2.000000e-01 : f32
    %30 = vector.broadcast %cst_17 : f32 to vector<16x16xf32>
    %31 = arith.mulf %30, %27 : vector<16x16xf32>
    %32 = arith.select %29, %27, %31 : vector<16x16xi1>, vector<16x16xf32>
    %33 = arith.addf %32, %2 : vector<16x16xf32>
    %cst_18 = arith.constant dense<0xFF800000> : vector<16xf32>
    %34 = vector.multi_reduction <maximumf>, %33, %cst_18 [1] : vector<16x16xf32> to vector<16xf32>
    %35 = vector.shape_cast %34 : vector<16xf32> to vector<16x1xf32>
    %36 = vector.broadcast %35 : vector<16x1xf32> to vector<16x16xf32>
    %37 = arith.subf %33, %36 : vector<16x16xf32>
    %38 = math.exp %37 : vector<16x16xf32>
    %cst_19 = arith.constant dense<0.000000e+00> : vector<16xf32>
    %39 = vector.multi_reduction <add>, %38, %cst_19 [1] : vector<16x16xf32> to vector<16xf32>
    %40 = vector.shape_cast %39 : vector<16xf32> to vector<16x1xf32>
    %41 = tpu.reciprocal %40 {approx = true} : vector<16x1xf32> -> vector<16x1xf32>
    %42 = vector.broadcast %41 : vector<16x1xf32> to vector<16x16xf32>
    %43 = arith.mulf %38, %42 : vector<16x16xf32>
    %44 = arith.truncf %43 : vector<16x16xf32> to vector<16x16xbf16>
    %45 = arith.truncf %21 : vector<16x128xf32> to vector<16x128xbf16>
    %cst_20 = arith.constant dense<0.000000e+00> : vector<16x128xf32>
    %46 = tpu.matmul %44, %45, %cst_20 {dimension_numbers = #tpu.dot_dimension_numbers<[1], [0], [0], [1], [0, 0, 1, 1], [], []>} : vector<16x16xbf16>, vector<16x128xbf16>, vector<16x128xf32> -> vector<16x128xf32>
    %47 = vector.broadcast %18 : vector<1x128xf32> to vector<16x128xf32>
    %48 = arith.addf %46, %47 : vector<16x128xf32>
    %cst_21 = arith.constant 0.000000e+00 : f32
    %49 = vector.broadcast %cst_21 : f32 to vector<16x128xf32>
    %50 = arith.maximumf %48, %49 : vector<16x128xf32>
    %51 = vector.extract_strided_slice %50 {offsets = [0, 0], sizes = [16, 32], strides = [1, 1]} : vector<16x128xf32> to vector<16x32xf32>
    %52 = vector.broadcast %13 : vector<1x1xf32> to vector<16x16xf32>
    %53 = arith.mulf %52, %5 : vector<16x16xf32>
    %54 = vector.extract_strided_slice %11 {offsets = [2, 0], sizes = [1, 128], strides = [1, 1]} : vector<8x128xf32> to vector<1x128xf32>
    %55 = vector.extract_strided_slice %11 {offsets = [3, 0], sizes = [1, 128], strides = [1, 1]} : vector<8x128xf32> to vector<1x128xf32>
    %56 = vector.extract_strided_slice %11 {offsets = [5, 0], sizes = [1, 128], strides = [1, 1]} : vector<8x128xf32> to vector<1x128xf32>
    %57 = arith.truncf %51 : vector<16x32xf32> to vector<16x32xbf16>
    %58 = arith.truncf %9 : vector<32x128xf32> to vector<32x128xbf16>
    %cst_22 = arith.constant dense<0.000000e+00> : vector<16x128xf32>
    %59 = tpu.matmul %57, %58, %cst_22 {dimension_numbers = #tpu.dot_dimension_numbers<[1], [0], [0], [1], [0, 0, 1, 1], [], []>} : vector<16x32xbf16>, vector<32x128xbf16>, vector<16x128xf32> -> vector<16x128xf32>
    %cst_23 = arith.constant dense<0.000000e+00> : vector<1x16xf32>
    %60 = tpu.matmul %54, %59, %cst_23 {dimension_numbers = #tpu.dot_dimension_numbers<[1], [1], [0], [0], [0, 0, 1, 0], [], []>} : vector<1x128xf32>, vector<16x128xf32>, vector<1x16xf32> -> vector<1x16xf32>
    %cst_24 = arith.constant dense<0.000000e+00> : vector<16x1xf32>
    %61 = tpu.matmul %59, %55, %cst_24 {dimension_numbers = #tpu.dot_dimension_numbers<[1], [1], [0], [0], [0, 0, 1, 0], [], []>} : vector<16x128xf32>, vector<1x128xf32>, vector<16x1xf32> -> vector<16x1xf32>
    %62 = vector.broadcast %61 : vector<16x1xf32> to vector<16x16xf32>
    %63 = vector.broadcast %60 : vector<1x16xf32> to vector<16x16xf32>
    %64 = arith.addf %62, %63 : vector<16x16xf32>
    %65 = arith.addf %64, %53 : vector<16x16xf32>
    %cst_25 = arith.constant 0.000000e+00 : f32
    %66 = vector.broadcast %cst_25 : f32 to vector<16x16xf32>
    %67 = arith.cmpf oge, %65, %66 : vector<16x16xf32>
    %cst_26 = arith.constant 2.000000e-01 : f32
    %68 = vector.broadcast %cst_26 : f32 to vector<16x16xf32>
    %69 = arith.mulf %68, %65 : vector<16x16xf32>
    %70 = arith.select %67, %65, %69 : vector<16x16xi1>, vector<16x16xf32>
    %71 = arith.addf %70, %2 : vector<16x16xf32>
    %cst_27 = arith.constant dense<0xFF800000> : vector<16xf32>
    %72 = vector.multi_reduction <maximumf>, %71, %cst_27 [1] : vector<16x16xf32> to vector<16xf32>
    %73 = vector.shape_cast %72 : vector<16xf32> to vector<16x1xf32>
    %74 = vector.broadcast %73 : vector<16x1xf32> to vector<16x16xf32>
    %75 = arith.subf %71, %74 : vector<16x16xf32>
    %76 = math.exp %75 : vector<16x16xf32>
    %cst_28 = arith.constant dense<0.000000e+00> : vector<16xf32>
    %77 = vector.multi_reduction <add>, %76, %cst_28 [1] : vector<16x16xf32> to vector<16xf32>
    %78 = vector.shape_cast %77 : vector<16xf32> to vector<16x1xf32>
    %79 = tpu.reciprocal %78 {approx = true} : vector<16x1xf32> -> vector<16x1xf32>
    %80 = vector.broadcast %79 : vector<16x1xf32> to vector<16x16xf32>
    %81 = arith.mulf %76, %80 : vector<16x16xf32>
    %82 = arith.truncf %81 : vector<16x16xf32> to vector<16x16xbf16>
    %83 = arith.truncf %59 : vector<16x128xf32> to vector<16x128xbf16>
    %cst_29 = arith.constant dense<0.000000e+00> : vector<16x128xf32>
    %84 = tpu.matmul %82, %83, %cst_29 {dimension_numbers = #tpu.dot_dimension_numbers<[1], [0], [0], [1], [0, 0, 1, 1], [], []>} : vector<16x16xbf16>, vector<16x128xbf16>, vector<16x128xf32> -> vector<16x128xf32>
    %85 = vector.broadcast %56 : vector<1x128xf32> to vector<16x128xf32>
    %86 = arith.addf %84, %85 : vector<16x128xf32>
    %87 = vector.extract_strided_slice %86 {offsets = [0, 0], sizes = [16, 32], strides = [1, 1]} : vector<16x128xf32> to vector<16x32xf32>
    %88 = arith.truncf %87 : vector<16x32xf32> to vector<16x32xbf16>
    %89 = arith.truncf %10 : vector<32x128xf32> to vector<32x128xbf16>
    %cst_30 = arith.constant dense<0.000000e+00> : vector<16x128xf32>
    %90 = tpu.matmul %88, %89, %cst_30 {dimension_numbers = #tpu.dot_dimension_numbers<[1], [0], [0], [1], [0, 0, 1, 1], [], []>} : vector<16x32xbf16>, vector<32x128xbf16>, vector<16x128xf32> -> vector<16x128xf32>
    %91 = vector.extract_strided_slice %11 {offsets = [6, 0], sizes = [1, 128], strides = [1, 1]} : vector<8x128xf32> to vector<1x128xf32>
    %92 = vector.broadcast %91 : vector<1x128xf32> to vector<16x128xf32>
    %93 = arith.addf %90, %92 : vector<16x128xf32>
    %c0_31 = arith.constant 0 : index
    %c0_32 = arith.constant 0 : index
    %c0_33 = arith.constant 0 : index
    %94 = vector.load %arg4[%c0_31, %c0_32, %c0_33] : memref<1x16x128xf32, #tpu.memory_space<vmem>>, vector<1x16x128xf32>
    %95 = vector.shape_cast %94 : vector<1x16x128xf32> to vector<16x128xf32>
    %96 = vector.shape_cast %93 : vector<16x128xf32> to vector<1x16x128xf32>
    tpu.vector_store %arg4[%c0_31, %c0_32, %c0_33], %96 {strides = array<i32>} : memref<1x16x128xf32, #tpu.memory_space<vmem>>, vector<1x16x128xf32>,
    return
  }
  func.func @transform_0(%arg0: i32) -> (i32, i32, i32, i32) {
    %c0_i32 = arith.constant 0 : i32
    %c0_i32_0 = arith.constant 0 : i32
    %c0_i32_1 = arith.constant 0 : i32
    %c0_i32_2 = arith.constant 0 : i32
    return %arg0, %c0_i32, %c0_i32_0, %c0_i32_1 : i32, i32, i32, i32
  }
  func.func @transform_1(%arg0: i32) -> (i32, i32, i32) {
    %c0_i32 = arith.constant 0 : i32
    %c0_i32_0 = arith.constant 0 : i32
    %c0_i32_1 = arith.constant 0 : i32
    return %arg0, %c0_i32, %c0_i32_0 : i32, i32, i32
  }
  func.func @transform_2(%arg0: i32) -> (i32, i32) {
    %c0_i32 = arith.constant 0 : i32
    %c0_i32_0 = arith.constant 0 : i32
    %c0_i32_1 = arith.constant 0 : i32
    return %c0_i32, %c0_i32_0 : i32, i32
  }
  func.func @transform_3(%arg0: i32) -> (i32, i32, i32) {
    %c0_i32 = arith.constant 0 : i32
    %c0_i32_0 = arith.constant 0 : i32
    %c0_i32_1 = arith.constant 0 : i32
    return %arg0, %c0_i32, %c0_i32_0 : i32, i32, i32
  }
}

</mosaic_0001>

<bundles_post_ra>
// kernel: extended_electrical_grid_forward.1
= control target key start
LH: loop header
LB: loop body
LE: loop exit
PB: predicated region body
PF: predicated region fallthrough
CT: control target
= control target key end

     0   :  { %8 = vsyncpa [#allocation3], 0  ;;  %s1293_s0 = inlined_call_operand.vmem [shape: bf16[4,2,16,16], index: 0, kind: input, shape index: {}]   ;;  %s1294_s1 = inlined_call_operand.vmem [shape: f32[4,16,16], index: 1, kind: input, shape index: {}]   ;;  %s1295_s2 = inlined_call_operand.vmem [shape: f32[88,128], index: 2, kind: input, shape index: {}]   ;;  %s1296_s3 = inlined_call_operand.hbm [shape: f32[4,16,128], index: 3, kind: output, shape index: {}]  }
   0x1   :  { %10 = vsyncpa [#allocation3 + $0x1], 0  ;;  %s1063_s12 = smov 0   ;;  %s1065_s13 = smov 0  }
   0x2   :  { %s1067_s14 = smov 0   ;;  %s1069_s15 = smov 0  }
   0x3 LB: > { %s1084_s16 = sadd.s32 4294967295, %s1034_s15   ;;  %s802_s17 = sadd.s32 4294967294, %s1034_s15   ;;  %s1034_s15 = sphi %s1069_s15, %s1302_s15   ;;  %s1030_s14 = sphi %s1067_s14, %s1301_s14   ;;  %s1026_s13 = sphi %s1065_s13, %s1300_s13   ;;  %s1022_s12 = sphi %s1063_s12, %s1299_s12  }
   0x4   : > { %s1088_s18 = sadd.s32 1, %s1034_s15   ;;  %s96_s19 = sadd.s32 1, %s1030_s14 }
   0x5   : > { %s93_s20 = ssub.s32 %s1034_s15, %s1088_s18  ;;  %p106_p0 = scmp.ne.s32.totalorder %s1030_s14, %s1026_s13 }
   0x6   : > { %p94_p1 = scmp.eq.s32.totalorder %s93_s20, 0  ;;  %p107_p2 = scmp.eq.s32.totalorder %s1084_s16, 3 }
   0x7   : > { %p112_p3 = scmp.ne.s32.totalorder %s1026_s13, %s1022_s12  ;;  %p113_p4 = scmp.eq.s32.totalorder %s802_s17, 3 }
   0x8   : > { %s1099_s21 = scalar_select %p94_p1, %s1030_s14, %s96_s19  }
   0x9   : > { %p1101_p5 = por %p107_p2, %p106_p0  ;;  %p1105_p6 = por %p113_p4, %p112_p3 }
   0xa   : > { %p805_p7 = scmp.ge.s32.totalorder %s1034_s15, 1  ;;  %p150_p8 = scmp.lt.s32.totalorder %s1034_s15, 5 }
   0xc   : > { %p151_p9 = pnand %p805_p7, %p150_p8 }
   0xd   : > { %v201_v0 = vld [vmem:[%s1295_s2] sm:$0xff] (!%p151_p9)  ;;  %v202_v1 = vld [vmem:[%s1295_s2 + $0x8] sm:$0xff] (!%p151_p9)  ;;  %p179_p10 = scmp.lt.s32.totalorder (!%p151_p9), %s1084_s16, 3  ;;  %v1036_v2 = vmov (!%p151_p9), 0.0   ;;  %vm1037_vm0 = vmmov (!%p151_p9), 0   ;;  %vm221_vm1 = vcmask (!%p151_p9), 130048   ;;  %v336_v8 = vlaneseq (!%p151_p9) }
   0xe   : > { %154 = sbr.rel (%p151_p9) target bundleno = 2229 (0x8b5), region = 32  ;;  %853 = vmatprep.subr.bf16.mxu0 (!%p151_p9), %v1036_v2  ;;  %v220_v3 = vpack.c.bf16 (!%p151_p9), %v202_v1, %v201_v0  ;;  %855 = vmatprep.mubr.msk.bf16.mxu0 (!%p151_p9), %vm1037_vm0, %v1036_v2  ;;  %v1038_v7 = vmov (!%p151_p9), 0.0|0.0   ;;  %v1142_v11 = vld [vmem:[%s1295_s2 + $0x50] sm:$0xff] (!%p151_p9)  ;;  %vm446_vm4 = vcmask (!%p151_p9), 261120   ;;  %s176_s17 = sand.u32 (!%p151_p9), 1, %s1026_s13  }
   0xf   : > { %863 = vmatprep.mubr.msk.f32.mxu1 (!%p151_p9), %vm1037_vm0, %v1036_v2  ;;  %901 = vmatprep.subr.bf16.mxu1 (!%p151_p9), %v1038_v7  ;;  %v1136_v9 = vshrl.u32 (!%p151_p9), %v336_v8, 7  ;;  %v213_v20 = vrot.slane (!%p151_p9), %v1142_v11, 7  ;;  %v203_v1 = vld [vmem:[%s1295_s2 + $0x10] sm:$0xff] (!%p151_p9)  ;;  %s806_s19 = sshll.u32 (!%p151_p9), %s176_s17, 4  ;;  %s825_s25 = sshll.u32 (!%p151_p9), %s1084_s16, 8 }
  0x10   : > { %854 = vmatpush3.bf16.msra.mxu0 (!%p151_p9), %v220_v3  ;;  %v204_v3 = vld [vmem:[%s1295_s2 + $0x18] sm:$0xff] (!%p151_p9)  ;;  %s178_s20 = scalar_lea.vmem (!%p151_p9), [#allocation2], %s806_s19 }
  0x11   : > { %866 = vmatprep.subr.bf16.mxu0 (!%p151_p9), %v1036_v2  ;;  %v338_v10 = vsub.s32 (!%p151_p9), 1, %v1136_v9  ;;  %907 = vpush (!%p151_p9), %v213_v20  ;;  %v348_v23 = vsub.s32 (!%p151_p9), 0, %v1136_v9  ;;  %v388_v8 = vsub.s32 (!%p151_p9), 4, %v1136_v9  ;;  %s728_s24 = sshll.u32 (!%p151_p9), %s178_s20, 4  ;;  %s1245_s24 = int_to_ptr.vmem [resolvable:$true] %s728_s24 }
  0x13   : > { %v339_v12 = vrot.slane (!%p151_p9), %v1142_v11, %v338_v10  ;;  %v389_v10 = vrot.slane (!%p151_p9), %v1142_v11, %v388_v8 }
  0x15   : > { %s1122_s28 = scalar_select %p179_p10, %s1084_s16, 3 }
  0x16   : > { %s972_s16 = scalar_lea.vmem %s1245_s24, 256 }
  0x17   : > { %s823_s29 = sshll.u32 %s1122_s28, 4  ;;  %s1250_s28 = scalar_lea.hbm %s1296_s3, %s825_s25 }
  0x18   : > { %s188_s5 = scalar_lea.vmem %s1294_s1, %s823_s29  ;;  %s183_s10 = scalar_lea.vmem %s1293_s0, %s823_s29 }
  0x19   : > { %v199_v4 = vld [vmem:[%s188_s5] sm:$0xff]  ;;  %v200_v5 = vld [vmem:[%s188_s5 + $0x8] sm:$0xff]  ;;  %s1039_s29 = smov 127   ;;  %p973_p11 = scmp.ne.s32.totalorder %s1245_s24, %s972_s16 }
  0x1a   : > { %v219_v6 = vpack.c.bf16 %v200_v5, %v199_v4  ;;  %v1157_v21 = vld [vmem:[%s183_s10 + $0x8] sm:$0xff]   ;;  %v1168_v35 = vld [vmem:[%s183_s10] sm:$0xff]   ;;  %v444_v4 = vpack.c.bf16 %v204_v3, %v203_v1 }
  0x1b   : > { %v832_v24 = vunpack.c.l.bf16 %v1157_v21  ;;  %v833_v25 = vunpack.c.h.bf16 %v1157_v21  ;;  %v828_v38 = vunpack.c.l.bf16 %v1168_v35  ;;  %v829_v41 = vunpack.c.h.bf16 %v1168_v35  ;;  %v205_v5 = vld [vmem:[%s1295_s2 + $0x20] sm:$0xff]  ;;  %p974_p12 = pnand %p973_p11, %p1101_p5 }
  0x1c   : > { %856 = vmatmul.mubr.msk.bf16.vlgmr.msra.gmra.mrb[0].mxu0 %vm221_vm1, %v219_v6  ;;  %v206_v6 = vld [vmem:[%s1295_s2 + $0x28] sm:$0xff] }
  0x1d   : > { %868 = vmatprep.mubr.msk.bf16.mxu0 %vm1037_vm0, %v1036_v2  ;;  %p975_p13 = pneg %p974_p12 }
  0x42   : > { %s908_s11 = spop %907 }
  0x43   : > { %v215_v26 = vstv %s908_s11 }
  0x44   : > { %v217_v29 = vmul.f32 %v832_v24, %v215_v26  ;;  %v218_v30 = vmul.f32 %v833_v25, %v215_v26  ;;  %v565_v26 = vsub.s32 3, %v1136_v9 }
  0xef   : > { %v259_v13 = vpop.f32.mrb[0].mxu0 }
  0xf0   : > { %v857_v14 = vpop.f32.mrb[1].mxu0  ;;  %v340_v15 = vmul.f32 %v339_v12, %v259_v13 }
  0xf1   : > { %v262_v16 = vpop.f32.mrb[2].mxu0 }
  0xf2   : > { %342 = vadd.xlane.f32.xlu0 %v340_v15  ;;  %v858_v17 = vpop.f32.mrb[3].mxu0  ;;  %v902_v18 = vpack.c.bf16 %v262_v16, %v259_v13  ;;  %v341_v19 = vmul.f32 %v339_v12, %v262_v16 }
  0xf4   : > { %903 = vmatpush3.bf16.xpose.msra.mxu1 %v902_v18  ;;  %867 = vmatpush3.bf16.msra.mxu0 %v902_v18 }
  0xf5   : > { %872 = vmatprep.subr.bf16.mxu1 %v1036_v2  ;;  %904 = vmatprep.subr.bf16.mxu0 %v1038_v7  ;;  %v445_v7 = vpack.c.bf16 %v206_v6, %v205_v5  ;;  %v207_v6 = vld [vmem:[%s1295_s2 + $0x30] sm:$0xff] }
  0xf6   : > { %344 = vadd.xlane.f32.xlu0 %v341_v19 }
  0xfb   : > { %864 = vmatmul.mubr.f32.vlgmr.msra.gmra.mrb[0].mxu1 %v1142_v11 }
  0xfc   : > { %876 = vmatprep.mubr.msk.bf16.mxu1 %vm1037_vm0, %v1036_v2  ;;  %873 = vmatpush3.bf16.msra.mxu1 %v444_v4 }
  0xfd   : > { %874 = vmatprep.subr.bf16.mxu1 %v1036_v2 }
 0x100   : > { %875 = vmatpush3.bf16.msra.mxu1 %v445_v7  ;;  %v208_v7 = vld [vmem:[%s1295_s2 + $0x38] sm:$0xff] }
 0x101   : > { %893 = vmatprep.subr.bf16.mxu1 %v1036_v2  ;;  %v662_v8 = vpack.c.bf16 %v208_v7, %v207_v6 }
 0x17f   : > { %v343_v22 = vpop.xlane.xlu0 %342 }
 0x183   : > { %v345_v32 = vpop.xlane.xlu0 %344 }
 0x1ce   : > { %v332_v27 = vpop.f32.mrb[0].mxu1 }
 0x1cf   : > { %v349_v28 = vrot.slane %v332_v27, %v348_v23  ;;  %v865_v31 = vpop.f32.mrb[1].mxu1  ;;  %v566_v27 = vrot.slane %v1142_v11, %v565_v26 }
 0x1d1   : > { %v350_v33 = vadd.f32 %v349_v28, %v343_v22  ;;  %v351_v34 = vadd.f32 %v349_v28, %v345_v32 }
 0x1d3   : > { %v352_v36 = vadd.f32 %v350_v33, %v217_v29  ;;  %v353_v37 = vadd.f32 %v351_v34, %v218_v30 }
 0x1d5   : > { %vm354_vm2 = vcmp.ge.f32.partialorder %v352_v36, 0.0  ;;  %v356_v39 = vmul.f32 0.2, %v352_v36  ;;  %vm355_vm3 = vcmp.ge.f32.partialorder %v353_v37, 0.0  ;;  %v357_v40 = vmul.f32 0.2, %v353_v37 }
 0x1d7   : > { %v358_v42 = vsel %vm354_vm2, %v352_v36, %v356_v39  ;;  %v359_v43 = vsel %vm355_vm3, %v353_v37, %v357_v40  ;;  %v491_v36 = vrot.slane %v1142_v11, 2 }
 0x1d8   : > { %v360_v44 = vadd.f32 %v828_v38, %v358_v42  ;;  %v361_v46 = vadd.f32 %v829_v41, %v359_v43 }
 0x1da   : > { %v362_v45 = vsel %vm221_vm1, %v360_v44, -inf  ;;  %v365_v47 = vsel %vm221_vm1, %v361_v46, -inf }
 0x1db   : > { %363 = vmax.xlane.f32.xlu1 %v362_v45 }
 0x1df   : > { %366 = vmax.xlane.f32.xlu1 %v365_v47 }
 0x268   : > { %v364_v48 = vpop.xlane.xlu1 %363 }
 0x269   : > { %v368_v49 = vsub.f32 %v360_v44, %v364_v48 }
 0x26b   : > { %v370_v50 = vmul.f32 1.442695, %v368_v49 }
 0x26c   : > { %v367_v51 = vpop.xlane.xlu1 %366 }
 0x26d   : > { %956 = vpow2.f32 %v370_v50  ;;  %v369_v52 = vsub.f32 %v361_v46, %v367_v51 }
 0x26f   : > { %v372_v53 = vmul.f32 1.442695, %v369_v52 }
 0x271   : > { %958 = vpow2.f32 %v372_v53 }
 0x277   : > { %v957_v54 = vpop.eup %956 }
 0x278   : > { %v374_v55 = vsel %vm221_vm1, %v957_v54, 0.0 }
 0x279   : > { %375 = vadd.xlane.f32.xlu0 %v374_v55 }
 0x27b   : > { %v959_v56 = vpop.eup %958 }
 0x27c   : > { %v377_v57 = vsel %vm221_vm1, %v959_v56, 0.0 }
 0x27d   : > { %378 = vadd.xlane.f32.xlu1 %v377_v57 }
 0x28f   : > { %436 = vrot.lane.b32.xlu0 %v213_v20, %s1039_s29  ;;  %s1252_s29 = scalar_lea.sflag [#allocation3], %s176_s17 }
 0x306   : > { %v376_v58 = vpop.xlane.xlu0 %375 }
 0x307   : > { %960 = vrcp.f32 %v376_v58 }
 0x30a   : > { %v379_v59 = vpop.xlane.xlu1 %378  ;;  %v437_v20 = vpop.permute.xlu0 %436 }
 0x30b   : > { %962 = vrcp.f32 %v379_v59  ;;  %909 = vpush %v437_v20 }
 0x311   : > { %v961_v60 = vpop.eup %960 }
 0x312   : > { %v382_v62 = vmul.f32 %v961_v60, %v957_v54 }
 0x315   : > { %v963_v61 = vpop.eup %962 }
 0x316   : > { %v383_v63 = vmul.f32 %v963_v61, %v959_v56 }
 0x318   : > { %v384_v0 = vpack.c.bf16 %v383_v63, %v382_v62 }
 0x31a   : > { %869 = vmatmul.mubr.msk.bf16.vlgmr.msra.gmra.mrb[4].mxu0 %vm221_vm1, %v384_v0 }
 0x31b   : > { %884 = vmatprep.mubr.msk.f32.mxu0 %vm1037_vm0, %v1036_v2 }
 0x33c   : > { %s910_s30 = spop %909 }
 0x33d   : > { %v439_v39 = vstv %s910_s30  ;;  %s1040_s30 = smov [#allocation2]  }
 0x33e   : > { %v441_v43 = vmul.f32 %v832_v24, %v439_v39  ;;  %v442_v44 = vmul.f32 %v833_v25, %v439_v39  ;;  %s976_s4 = sshll.u32 %s1040_s30, 4  ;;  %s977_s4 = int_to_ptr.vmem [resolvable:$false] %s976_s4 }
 0x33f   : > { %s978_s5 = scalar_lea.vmem %s977_s4, 512  ;;  %p979_p0 = scmp.lt.s32.totalorder %s1245_s24, %s977_s4 }
 0x340   : > { %p980_p1 = scmp.lt.s32.totalorder %s978_s5, %s972_s16 }
 0x342   : > { %p981_p2 = por %p980_p1, %p979_p0 }
 0x344   : > { %p982_p3 = pnand %p981_p2, %p975_p13 }
 0x3ed   : > { %v427_v12 = vpop.f32.mrb[4].mxu0 }
 0x3ee   : > { %v428_v13 = vadd.f32 %v427_v12, %v389_v10  ;;  %v870_v14 = vpop.f32.mrb[5].mxu0  ;;  %v210_v12 = vld [vmem:[%s1295_s2 + $0x48] sm:$0xff] }
 0x3ef   : > { %v430_v15 = vpop.f32.mrb[6].mxu0  ;;  %v615_v14 = vsub.s32 5, %v1136_v9 }
 0x3f0   : > { %v431_v16 = vadd.f32 %v430_v15, %v389_v10  ;;  %v871_v17 = vpop.f32.mrb[7].mxu0  ;;  %v434_v18 = vmax.f32 %v428_v13, 0.0  ;;  %v209_v10 = vld [vmem:[%s1295_s2 + $0x40] sm:$0xff] }
 0x3f1   : > { %v663_v13 = vpack.c.bf16 %v210_v12, %v209_v10  ;;  %v616_v15 = vrot.slane %v1142_v11, %v615_v14 }
 0x3f2   : > { %v435_v19 = vmax.f32 %v431_v16, 0.0 }
 0x3f4   : > { %v443_v22 = vpack.c.bf16 %v435_v19, %v434_v18 }
 0x3f6   : > { %877 = vmatmul.mubr.msk.bf16.vlgmr.msra.gmra.mrb[4].mxu1 %vm446_vm4, %v443_v22 }
 0x3f7   : > { %897 = vmatprep.mubr.msk.bf16.mxu1 %vm1037_vm0, %v1036_v2  ;;  %894 = vmatpush3.bf16.msra.mxu1 %v662_v8 }
 0x3f8   : > { %895 = vmatprep.subr.bf16.mxu1 %v1036_v2 }
 0x3fb   : > { %896 = vmatpush3.bf16.msra.mxu1 %v663_v13 }
 0x4c9   : > { %v484_v28 = vpop.f32.mrb[4].mxu1 }
 0x4ca   : > { %v878_v29 = vpop.f32.mrb[5].mxu1  ;;  %v567_v30 = vmul.f32 %v566_v27, %v484_v28 }
 0x4cb   : > { %v487_v31 = vpop.f32.mrb[6].mxu1 }
 0x4cc   : > { %v905_v32 = vpack.c.bf16 %v487_v31, %v484_v28  ;;  %569 = vadd.xlane.f32.xlu1 %v567_v30  ;;  %v879_v33 = vpop.f32.mrb[7].mxu1  ;;  %v568_v34 = vmul.f32 %v566_v27, %v487_v31  ;;  %v666_v27 = vsub.s32 6, %v1136_v9 }
 0x4ce   : > { %906 = vmatpush3.bf16.xpose.msra.mxu0 %v905_v32  ;;  %v667_v28 = vrot.slane %v1142_v11, %v666_v27 }
 0x4cf   : > { %887 = vmatprep.subr.bf16.mxu0 %v1036_v2 }
 0x4d0   : > { %571 = vadd.xlane.f32.xlu1 %v568_v34 }
 0x4d5   : > { %885 = vmatmul.mubr.f32.vlgmr.msra.gmra.mrb[8].mxu0 %v491_v36 }
 0x4d6   : > { %888 = vmatpush3.bf16.msra.mxu0 %v905_v32  ;;  %889 = vmatprep.mubr.msk.bf16.mxu0 %vm1037_vm0, %v1036_v2 }
 0x559   : > { %v570_v37 = vpop.xlane.xlu1 %569 }
 0x55d   : > { %v572_v46 = vpop.xlane.xlu1 %571 }
 0x5a8   : > { %v559_v40 = vpop.f32.mrb[8].mxu0 }
 0x5a9   : > { %v576_v42 = vrot.slane %v559_v40, %v348_v23  ;;  %v886_v45 = vpop.f32.mrb[9].mxu0 }
 0x5ab   : > { %v577_v47 = vadd.f32 %v576_v42, %v570_v37  ;;  %v578_v48 = vadd.f32 %v576_v42, %v572_v46 }
 0x5ad   : > { %v579_v49 = vadd.f32 %v577_v47, %v441_v43  ;;  %v580_v50 = vadd.f32 %v578_v48, %v442_v44 }
 0x5af   : > { %v583_v51 = vmul.f32 0.2, %v579_v49  ;;  %v584_v52 = vmul.f32 0.2, %v580_v50  ;;  %vm581_vm5 = vcmp.ge.f32.partialorder %v579_v49, 0.0  ;;  %vm582_vm6 = vcmp.ge.f32.partialorder %v580_v50, 0.0 }
 0x5b1   : > { %v585_v53 = vsel %vm581_vm5, %v579_v49, %v583_v51  ;;  %v586_v54 = vsel %vm582_vm6, %v580_v50, %v584_v52 }
 0x5b2   : > { %v587_v23 = vadd.f32 %v828_v38, %v585_v53  ;;  %v588_v21 = vadd.f32 %v829_v41, %v586_v54 }
 0x5b4   : > { %v589_v24 = vsel %vm221_vm1, %v587_v23, -inf  ;;  %v592_v25 = vsel %vm221_vm1, %v588_v21, -inf }
 0x5b5   : > { %590 = vmax.xlane.f32.xlu1 %v589_v24 }
 0x5b9   : > { %593 = vmax.xlane.f32.xlu1 %v592_v25 }
 0x642   : > { %v591_v55 = vpop.xlane.xlu1 %590 }
 0x643   : > { %v595_v56 = vsub.f32 %v587_v23, %v591_v55 }
 0x645   : > { %v597_v57 = vmul.f32 1.442695, %v595_v56 }
 0x646   : > { %v594_v58 = vpop.xlane.xlu1 %593 }
 0x647   : > { %964 = vpow2.f32 %v597_v57  ;;  %v596_v59 = vsub.f32 %v588_v21, %v594_v58 }
 0x649   : > { %v599_v60 = vmul.f32 1.442695, %v596_v59 }
 0x64b   : > { %966 = vpow2.f32 %v599_v60 }
 0x651   : > { %v965_v61 = vpop.eup %964 }
 0x652   : > { %v601_v38 = vsel %vm221_vm1, %v965_v61, 0.0 }
 0x653   : > { %602 = vadd.xlane.f32.xlu1 %v601_v38 }
 0x655   : > { %v967_v62 = vpop.eup %966 }
 0x656   : > { %v604_v35 = vsel %vm221_vm1, %v967_v62, 0.0 }
 0x657   : > { %605 = vadd.xlane.f32.xlu1 %v604_v35 }
 0x6e0   : > { %v603_v41 = vpop.xlane.xlu1 %602 }
 0x6e1   : > { %968 = vrcp.f32 %v603_v41 }
 0x6e4   : > { %v606_v63 = vpop.xlane.xlu1 %605 }
 0x6e5   : > { %970 = vrcp.f32 %v606_v63 }
 0x6eb   : > { %v969_v0 = vpop.eup %968 }
 0x6ec   : > { %v609_v3 = vmul.f32 %v969_v0, %v965_v61 }
 0x6ef   : > { %v971_v1 = vpop.eup %970 }
 0x6f0   : > { %v610_v4 = vmul.f32 %v971_v1, %v967_v62 }
 0x6f2   : > { %v611_v5 = vpack.c.bf16 %v610_v4, %v609_v3 }
 0x6f4   : > { %890 = vmatmul.mubr.msk.bf16.vlgmr.msra.gmra.mrb[12].mxu0 %vm221_vm1, %v611_v5 }
 0x7c7   : > { %v654_v16 = vpop.f32.mrb[12].mxu0 }
 0x7c8   : > { %v891_v17 = vpop.f32.mrb[13].mxu0  ;;  %v655_v19 = vadd.f32 %v654_v16, %v616_v15 }
 0x7c9   : > { %v657_v18 = vpop.f32.mrb[14].mxu0 }
 0x7ca   : > { %v658_v2 = vadd.f32 %v657_v18, %v616_v15  ;;  %v892_v22 = vpop.f32.mrb[15].mxu0 }
 0x7cc   : > { %v661_v26 = vpack.c.bf16 %v658_v2, %v655_v19 }
 0x7ce   : > { %898 = vmatmul.mubr.msk.bf16.vlgmr.msra.gmra.mrb[8].mxu1 %vm446_vm4, %v661_v26 }
 0x8a1   : > { %v705_v29 = vpop.f32.mrb[8].mxu1 }
 0x8a2   : > { %v706_v30 = vadd.f32 %v705_v29, %v667_v28  ;;  %v899_v31 = vpop.f32.mrb[9].mxu1 }
 0x8a3   : > { %v708_v32 = vpop.f32.mrb[10].mxu1 }
 0x8a4   : > { %712 = vst [vmem:[%s178_s20] sm:$0xff] %v706_v30  ;;  %v709_v9 = vadd.f32 %v708_v32, %v667_v28  ;;  %v900_v11 = vpop.f32.mrb[11].mxu1 }
 0x8a6   : > { %713 = vst [vmem:[%s178_s20 + $0x8] sm:$0xff] %v709_v9 }
 0x8a7   : > { %985 = shalt.err (!%p982_p3)
}
 0x8a8   : > { %s986_s6 = scalar_lea.hbm %s1250_s28, 256  ;;  %s990_s9 = scalar_lea.hbm %s1296_s3, 1024 }
 0x8a9   : > { %p987_p4 = scmp.ne.s32.totalorder %s1250_s28, %s986_s6  ;;  %p991_p9 = scmp.lt.u32.totalorder %s1250_s28, %s1296_s3 }
 0x8aa   : > { %p992_p10 = scmp.lt.u32.totalorder %s990_s9, %s986_s6  ;;  %p994_p12 = scmp.lt.u32.totalorder %s986_s6, %s1250_s28 }
 0x8ab   : > { %p988_p7 = pnand %p987_p4, %p1101_p5 }
 0x8ac   : > { %p993_p11 = por %p992_p10, %p991_p9 }
 0x8ad   : > { %p989_p8 = pneg %p988_p7 }
 0x8ae   : > { %p995_p13 = por %p994_p12, %p993_p11 }
 0x8b0   : > { %p996_p0 = pnand %p995_p13, %p989_p8 }
 0x8b2   : > { %999 = shalt.err (!%p996_p0)
}
 0x8b3   : > { %s1041_s17 = smov 128   ;;  %s1042_s19 = smov 8  }
 0x8b4   : > { %911 = dma.vmem_to_hbm [thread:$0]  (%p1101_p5), %s1245_s24, 256, %s1250_s28, %s1252_s29, %s1041_s17, %s1041_s17, %s1042_s19  }
 0x8b5 PF: > { %p917_p1 = scmp.ge.s32.totalorder %s1034_s15, 2  ;;  %s743_s20 = sand.u32 1, %s1022_s12  }
 0x8b6   : > { %s744_s25 = scalar_lea.sflag [#allocation3], %s743_s20 }
 0x8b7   : > { %p914_p2 = pnand %p917_p1, %p1105_p6 }
 0x8b9   : > { %1017 = dma.done.wait (!%p914_p2), %s744_s25, 256  }
 0x8ba   : > { %1019 = vsyncadd (!%p914_p2), %s744_s25, 4294967040  ;;  %p13_p3 = scmp.ge.s32.totalorder %s1088_s18, 6   ;;  %s1299_s12 = smov %s1026_s13 }
 0x8bb   : > { %s1300_s13 = smov %s1030_s14  ;;  %s1301_s14 = smov %s1099_s21 }
 0x8bc   : > { %s1302_s15 = smov %s1088_s18  ;;  %15 = sbr.rel (!%p13_p3) target bundleno = 3 (0x3), region = 71 }
 0x8c3   :  { %749 = vsyncpa [#allocation3], 1 }
 0x8c4   :  { %751 = vsyncpa [#allocation3 + $0x1], 1 }

</bundles_post_ra>
